<compile_context>
chip_gen: v5e
topology: v5e:2x2
jax: 0.10.0
libtpu: 0.0.40
codegen_flags: <defaults>
</compile_context>

<pallas_src>
import functools
from math import sqrt

import jax
import jax.numpy as jnp
from jax import lax
from jax.experimental import pallas as pl
from jax.experimental.pallas import tpu as pltpu


def _vmem_limit_bytes():
    """Scoped-VMEM request: 75% of physical, capped (v7x only has 64 MiB)."""
    try:
        cap = pltpu.get_tpu_info().vmem_capacity_bytes
        return min(int(cap * 3 // 4), 100 * 1024 * 1024)
    except Exception:
        return 48 * 1024 * 1024


_VMEM_LIMIT = _vmem_limit_bytes()


# ----------------------------------------------------------------------------
# Tile helpers
# ----------------------------------------------------------------------------
def _pick_sublane_tile(dim, preferred):
    """Tile for a second-to-last block dim: multiple of 8, or the full dim."""
    if dim <= preferred:
        return dim
    return (preferred // 8) * 8


def _pick_lane_tile(dim, preferred):
    """Tile for a last block dim: multiple of 128, or the full dim."""
    if dim <= preferred:
        return dim
    return (preferred // 128) * 128


def _pick_k_tile(dim, preferred):
    """Contraction-dim tile: must divide `dim` exactly (or be the full dim)."""
    if dim <= preferred:
        return dim
    t = (preferred // 128) * 128
    while t >= 128:
        if dim % t == 0:
            return t
        t -= 128
    # TODO(synk): no 128-multiple divides `dim`; single full-K block fallback
    # can be VMEM-heavy for large, oddly-sized d_model.
    return dim


# ----------------------------------------------------------------------------
# Tiled linear:  y = x @ W + b
# ----------------------------------------------------------------------------
def _linear_kernel_nok(x_ref, w_ref, b_ref, o_ref):
    o_ref[...] = (jnp.dot(x_ref[...], w_ref[...],
                          preferred_element_type=jnp.float32)
                  + b_ref[...].astype(jnp.float32)).astype(o_ref.dtype)


def _linear_kernel(x_ref, w_ref, b_ref, o_ref, acc_ref):
    k = pl.program_id(2)

    @pl.when(k == 0)
    def _():
        acc_ref[...] = jnp.zeros(acc_ref.shape, acc_ref.dtype)

    acc_ref[...] += jnp.dot(x_ref[...], w_ref[...],
                            preferred_element_type=jnp.float32)

    @pl.when(k == pl.num_programs(2) - 1)
    def _():
        o_ref[...] = (acc_ref[...]
                      + b_ref[...].astype(jnp.float32)).astype(o_ref.dtype)


def pallas_linear(x2d, w, b, *, out_dtype=None,
                  tile_m=512, tile_n=512, tile_k=1024):
    """x2d:(N,Din) @ w:(Din,Dout) + b:(Dout,) -> (N,Dout)."""
    n, din = x2d.shape
    dout = w.shape[1]
    out_dtype = out_dtype or x2d.dtype
    tm = _pick_sublane_tile(n, tile_m)
    tn = _pick_lane_tile(dout, tile_n)
    b2d = b.reshape(1, dout)

    itemsize = jnp.dtype(x2d.dtype).itemsize
    cost = pl.CostEstimate(
        flops=2 * n * din * dout,
        transcendentals=0,
        bytes_accessed=(n * din + din * dout + dout) * itemsize
        + n * dout * jnp.dtype(out_dtype).itemsize,
    )

    if din <= tile_k:
        # Whole contraction in one MXU pass: no K grid axis, no accumulator.
        return pl.pallas_call(
            _linear_kernel_nok,
            out_shape=jax.ShapeDtypeStruct((n, dout), out_dtype),
            grid_spec=pltpu.PrefetchScalarGridSpec(
                num_scalar_prefetch=0,
                grid=(pl.cdiv(n, tm), pl.cdiv(dout, tn)),
                in_specs=[
                    pl.BlockSpec((tm, din), lambda i, j: (i, 0)),
                    pl.BlockSpec((din, tn), lambda i, j: (0, j)),
                    pl.BlockSpec((1, tn), lambda i, j: (0, j)),
                ],
                out_specs=pl.BlockSpec((tm, tn), lambda i, j: (i, j)),
            ),
            compiler_params=pltpu.CompilerParams(
                dimension_semantics=("parallel", "parallel"),
                vmem_limit_bytes=_VMEM_LIMIT,
            ),
            cost_estimate=cost,
        )(x2d, w, b2d)

    tk = _pick_k_tile(din, tile_k)
    grid = (pl.cdiv(n, tm), pl.cdiv(dout, tn), din // tk)
    return pl.pallas_call(
        _linear_kernel,
        out_shape=jax.ShapeDtypeStruct((n, dout), out_dtype),
        grid_spec=pltpu.PrefetchScalarGridSpec(
            num_scalar_prefetch=0,
            grid=grid,
            in_specs=[
                pl.BlockSpec((tm, tk), lambda i, j, k: (i, k)),
                pl.BlockSpec((tk, tn), lambda i, j, k: (k, j)),
                pl.BlockSpec((1, tn), lambda i, j, k: (0, j)),
            ],
            out_specs=pl.BlockSpec((tm, tn), lambda i, j, k: (i, j)),
            scratch_shapes=[pltpu.VMEM((tm, tn), jnp.float32)],
        ),
        compiler_params=pltpu.CompilerParams(
            dimension_semantics=("parallel", "parallel", "arbitrary"),
            vmem_limit_bytes=_VMEM_LIMIT,
        ),
        cost_estimate=cost,
    )(x2d, w, b2d)


# ----------------------------------------------------------------------------
# Fused multi-output linear:  y_i = x @ W_i + b_i  (x read from HBM once)
# ----------------------------------------------------------------------------
def _make_fused_linear_kernel(n_out):
    def kernel(*refs):
        x_ref = refs[0]
        w_refs = refs[1:1 + n_out]
        b_refs = refs[1 + n_out:1 + 2 * n_out]
        o_refs = refs[1 + 2 * n_out:1 + 3 * n_out]
        acc_refs = refs[1 + 3 * n_out:]
        k = pl.program_id(1)

        @pl.when(k == 0)
        def _():
            for acc in acc_refs:
                acc[...] = jnp.zeros(acc.shape, acc.dtype)

        x = x_ref[...]
        for w_ref, acc in zip(w_refs, acc_refs):
            acc[...] += jnp.dot(x, w_ref[...],
                                preferred_element_type=jnp.float32)

        @pl.when(k == pl.num_programs(1) - 1)
        def _():
            for b_ref, o_ref, acc in zip(b_refs, o_refs, acc_refs):
                o_ref[...] = (acc[...]
                              + b_ref[...].astype(jnp.float32)
                              ).astype(o_ref.dtype)

    return kernel


def pallas_fused_linear(x2d, ws, bs, *, out_dtype=None,
                        tile_m=512, tile_k=1024):
    """Computes x @ W_i + b_i for several W_i in one pass over x.

    Each projection gets its own HBM output buffer, so the wrapper never has
    to slice a packed QKV buffer (which would materialize extra HBM copies).
    """
    n, din = x2d.shape
    n_out = len(ws)
    out_dtype = out_dtype or x2d.dtype
    tm = _pick_sublane_tile(n, tile_m)
    tk = _pick_k_tile(din, tile_k)
    grid = (pl.cdiv(n, tm), din // tk)
    douts = [w.shape[1] for w in ws]
    b2ds = [b.reshape(1, d) for b, d in zip(bs, douts)]

    in_specs = [pl.BlockSpec((tm, tk), lambda i, k: (i, k))]
    in_specs += [pl.BlockSpec((tk, d), lambda i, k: (k, 0)) for d in douts]
    in_specs += [pl.BlockSpec((1, d), lambda i, k: (0, 0)) for d in douts]
    out_specs = [pl.BlockSpec((tm, d), lambda i, k: (i, 0)) for d in douts]
    scratch = [pltpu.VMEM((tm, d), jnp.float32) for d in douts]

    itemsize = jnp.dtype(x2d.dtype).itemsize
    cost = pl.CostEstimate(
        flops=2 * n * din * sum(douts),
        transcendentals=0,
        bytes_accessed=(n * din + din * sum(douts) + sum(douts)) * itemsize
        + n * sum(douts) * jnp.dtype(out_dtype).itemsize,
    )
    return pl.pallas_call(
        _make_fused_linear_kernel(n_out),
        out_shape=tuple(jax.ShapeDtypeStruct((n, d), out_dtype) for d in douts),
        grid_spec=pltpu.PrefetchScalarGridSpec(
            num_scalar_prefetch=0,
            grid=grid,
            in_specs=in_specs,
            out_specs=out_specs,
            scratch_shapes=scratch,
        ),
        compiler_params=pltpu.CompilerParams(
            dimension_semantics=("parallel", "arbitrary"),
            vmem_limit_bytes=_VMEM_LIMIT,
        ),
        cost_estimate=cost,
    )(x2d, *ws, *b2ds)


# ----------------------------------------------------------------------------
# Flash attention over (B, L, H*d) blocks — online softmax along S tiles
# ----------------------------------------------------------------------------
def _flash_attention_kernel(q_ref, k_ref, v_ref, o_ref, lse_ref,
                            m_ref, l_ref, acc_ref,
                            *, n_heads, d_k, d_v, s_len, tile_s):
    si = pl.program_id(2)

    @pl.when(si == 0)
    def _():
        m_ref[...] = jnp.full(m_ref.shape, -jnp.inf, m_ref.dtype)
        l_ref[...] = jnp.zeros(l_ref.shape, l_ref.dtype)
        acc_ref[...] = jnp.zeros(acc_ref.shape, acc_ref.dtype)

    q = q_ref[0]                       # (TILE_L, H*d_k), scale folded into wq
    k = k_ref[0]                       # (TILE_S, H*d_k)
    v = v_ref[0]                       # (TILE_S, H*d_v)
    tile_l = q.shape[0]

    if s_len % tile_s != 0:            # static: only mask a ragged last S tile
        col = lax.broadcasted_iota(jnp.int32, (tile_l, tile_s), 1) + si * tile_s
        kv_mask = col < s_len
    else:
        kv_mask = None

    m_prev = m_ref[...]                # (TILE_L, H)
    l_prev = l_ref[...]                # (TILE_L, H)

    m_new_cols, p_sum_cols, pv_cols = [], [], []
    for h in range(n_heads):           # small static head count -> unrolled
        q_h = q[:, h * d_k:(h + 1) * d_k]
        k_h = k[:, h * d_k:(h + 1) * d_k]
        v_h = v[:, h * d_v:(h + 1) * d_v]
        # Q @ K^T without an explicit transpose: contract the d_k axes.
        s = lax.dot_general(q_h, k_h, (((1,), (1,)), ((), ())),
                            preferred_element_type=jnp.float32)  # (tl, ts)
        if kv_mask is not None:
            s = jnp.where(kv_mask, s, -jnp.inf)

        m_h_prev = m_prev[:, h:h + 1]
        m_h_new = jnp.maximum(m_h_prev, jnp.max(s, axis=-1, keepdims=True))
        p = jnp.exp(s - m_h_new)       # f32 exp (bf16 EUP only on v6e/v7x)

        m_new_cols.append(m_h_new)
        p_sum_cols.append(jnp.sum(p, axis=-1, keepdims=True))
        pv_cols.append(jnp.dot(p.astype(v_h.dtype), v_h,
                               preferred_element_type=jnp.float32))

    # Assemble full-width values, then write scratch once (lane-dense stores).
    m_new = jnp.concatenate(m_new_cols, axis=1)           # (tl, H)
    alpha = jnp.exp(m_prev - m_new)                        # (tl, H)
    l_ref[...] = alpha * l_prev + jnp.concatenate(p_sum_cols, axis=1)
    m_ref[...] = m_new

    pv = jnp.concatenate(pv_cols, axis=1)                  # (tl, H*d_v)
    alpha_full = jnp.concatenate(
        [jnp.broadcast_to(alpha[:, h:h + 1], (tile_l, d_v))
         for h in range(n_heads)], axis=1)                 # (tl, H*d_v)
    acc_ref[...] = alpha_full * acc_ref[...] + pv

    @pl.when(si == pl.num_programs(2) - 1)
    def _():
        l = l_ref[...]
        inv = pl.reciprocal(l, approx=False)               # (tl, H), accurate
        inv_full = jnp.concatenate(
            [jnp.broadcast_to(inv[:, h:h + 1], (tile_l, d_v))
             for h in range(n_heads)], axis=1)
        # One full-width lane-dense store for the whole (tl, H*d_v) output.
        o_ref[0] = (acc_ref[...] * inv_full).astype(o_ref.dtype)
        lse_ref[0] = (m_ref[...] + jnp.log(l)).astype(lse_ref.dtype)


def pallas_flash_attention(q, k, v, n_heads, *, tile_l=256, tile_s=1024):
    """q:(B,L,H*dk) k:(B,S,H*dk) v:(B,S,H*dv) -> out:(B,L,H*dv), lse:(B,L,H).

    q is expected to be pre-scaled (softmax scale folded into the projection).
    """
    B, L, hdk = q.shape
    S = k.shape[1]
    hdv = v.shape[2]
    d_k = hdk // n_heads
    d_v = hdv // n_heads

    tl = _pick_sublane_tile(L, tile_l)
    ts = _pick_sublane_tile(S, tile_s)
    grid = (B, pl.cdiv(L, tl), pl.cdiv(S, ts))

    kernel = functools.partial(
        _flash_attention_kernel, n_heads=n_heads,
        d_k=d_k, d_v=d_v, s_len=S, tile_s=ts)

    itemsize = jnp.dtype(q.dtype).itemsize
    cost = pl.CostEstimate(
        flops=2 * B * n_heads * L * S * (d_k + d_v),
        transcendentals=B * n_heads * L * S,
        bytes_accessed=(B * L * hdk + B * S * (hdk + hdv) + B * L * hdv)
        * itemsize + B * L * n_heads * 4,
    )
    return pl.pallas_call(
        kernel,
        out_shape=(
            jax.ShapeDtypeStruct((B, L, hdv), q.dtype),
            jax.ShapeDtypeStruct((B, L, n_heads), jnp.float32),
        ),
        grid_spec=pltpu.PrefetchScalarGridSpec(
            num_scalar_prefetch=0,
            grid=grid,
            in_specs=[
                pl.BlockSpec((1, tl, hdk), lambda b, li, si: (b, li, 0)),
                pl.BlockSpec((1, ts, hdk), lambda b, li, si: (b, si, 0)),
                pl.BlockSpec((1, ts, hdv), lambda b, li, si: (b, si, 0)),
            ],
            out_specs=[
                pl.BlockSpec((1, tl, hdv), lambda b, li, si: (b, li, 0)),
                pl.BlockSpec((1, tl, n_heads), lambda b, li, si: (b, li, 0)),
            ],
            scratch_shapes=[
                pltpu.VMEM((tl, n_heads), jnp.float32),   # running max
                pltpu.VMEM((tl, n_heads), jnp.float32),   # running denom
                pltpu.VMEM((tl, hdv), jnp.float32),       # running numerator
            ],
        ),
        compiler_params=pltpu.CompilerParams(
            dimension_semantics=("parallel", "parallel", "arbitrary"),
            vmem_limit_bytes=_VMEM_LIMIT,
        ),
        cost_estimate=cost,
    )(q, k, v)


# ----------------------------------------------------------------------------
# Optional attention-probability output (reconstructed from LSE, bf16)
# ----------------------------------------------------------------------------
def _attn_probs_kernel(q_ref, k_ref, lse_ref, a_ref, *, n_heads, d_k):
    q = q_ref[0]                       # pre-scaled q
    k = k_ref[0]
    lse = lse_ref[0]
    for h in range(n_heads):
        q_h = q[:, h * d_k:(h + 1) * d_k]
        k_h = k[:, h * d_k:(h + 1) * d_k]
        s = lax.dot_general(q_h, k_h, (((1,), (1,)), ((), ())),
                            preferred_element_type=jnp.float32)
        a_ref[0, h] = jnp.exp(s - lse[:, h:h + 1]).astype(a_ref.dtype)


def pallas_attention_probs(q, k, lse, n_heads, *,
                           tile_l=256, tile_s=1024, attn_dtype=jnp.bfloat16):
    B, L, hdk = q.shape
    S = k.shape[1]
    d_k = hdk // n_heads
    tl = _pick_sublane_tile(L, tile_l)
    ts = _pick_sublane_tile(S, tile_s)
    grid = (B, pl.cdiv(L, tl), pl.cdiv(S, ts))

    kernel = functools.partial(_attn_probs_kernel, n_heads=n_heads, d_k=d_k)
    itemsize = jnp.dtype(q.dtype).itemsize
    cost = pl.CostEstimate(
        flops=2 * B * n_heads * L * S * d_k,
        transcendentals=B * n_heads * L * S,
        bytes_accessed=(B * L * hdk + B * S * hdk) * itemsize
        + B * n_heads * L * S * jnp.dtype(attn_dtype).itemsize,
    )
    return pl.pallas_call(
        kernel,
        out_shape=jax.ShapeDtypeStruct((B, n_heads, L, S), attn_dtype),
        grid_spec=pltpu.PrefetchScalarGridSpec(
            num_scalar_prefetch=0,
            grid=grid,
            in_specs=[
                pl.BlockSpec((1, tl, hdk), lambda b, li, si: (b, li, 0)),
                pl.BlockSpec((1, ts, hdk), lambda b, li, si: (b, si, 0)),
                pl.BlockSpec((1, tl, n_heads), lambda b, li, si: (b, li, 0)),
            ],
            out_specs=pl.BlockSpec((1, n_heads, tl, ts),
                                   lambda b, li, si: (b, 0, li, si)),
        ),
        compiler_params=pltpu.CompilerParams(
            dimension_semantics=("parallel", "parallel", "parallel"),
            vmem_limit_bytes=_VMEM_LIMIT,
        ),
        cost_estimate=cost,
    )(q, k, lse)


# ----------------------------------------------------------------------------
# AttentionLayer forward (glue in plain JAX, hot paths in Pallas)
# ----------------------------------------------------------------------------
def attention_layer_forward(params, queries, keys, values,
                            attn_mask=None, tau=None, delta=None,
                            *, n_heads, mix=False, output_attention=False,
                            compute_dtype=jnp.bfloat16,
                            attn_dtype=jnp.bfloat16):
    # TODO(synk): attn_mask / tau / delta and attention dropout are not
    # implemented — this is FullAttention(mask_flag=False, dropout=0).
    del attn_mask, tau, delta
    B, L, _ = queries.shape
    _, S, _ = keys.shape
    H = n_heads

    wq, wk, wv, wo = params["wq"], params["wk"], params["wv"], params["wo"]
    bq, bk, bv, bo = params["bq"], params["bk"], params["bv"], params["bo"]
    out_dtype = queries.dtype

    dq_out, dk_out, dv_out = wq.shape[1], wk.shape[1], wv.shape[1]
    d_keys = dq_out // H
    d_values = dv_out // H

    # Fold the softmax scale into the query projection (done in f32, once).
    scale = 1.0 / sqrt(d_keys)
    wq = wq * scale
    bq = bq * scale

    fuse_qkv = (queries is keys) and (keys is values)   # self-attention
    fuse_kv = keys is values

    if compute_dtype is not None:   # bf16 default: MXU-native on all gens
        cast = lambda t: t.astype(compute_dtype)
        queries, keys, values = cast(queries), cast(keys), cast(values)
        wq, wk, wv, wo = cast(wq), cast(wk), cast(wv), cast(wo)
        # biases stay f32: added in f32 inside the kernels, negligible traffic.

    # Projections — fused into one pass over x when inputs are shared; each
    # projection gets its own HBM output (no packed-output slicing).
    if fuse_qkv:
        q2d, k2d, v2d = pallas_fused_linear(
            queries.reshape(B * L, -1), (wq, wk, wv), (bq, bk, bv))
    elif fuse_kv:
        q2d = pallas_linear(queries.reshape(B * L, -1), wq, bq)
        k2d, v2d = pallas_fused_linear(
            keys.reshape(B * S, -1), (wk, wv), (bk, bv))
    else:
        q2d = pallas_linear(queries.reshape(B * L, -1), wq, bq)
        k2d = pallas_linear(keys.reshape(B * S, -1), wk, bk)
        v2d = pallas_linear(values.reshape(B * S, -1), wv, bv)

    # Heads packed along lanes: (B, L, H*d) — no HBM transposes required.
    q = q2d.reshape(B, L, dq_out)
    k = k2d.reshape(B, S, dk_out)
    v = v2d.reshape(B, S, dv_out)

    out, lse = pallas_flash_attention(q, k, v, H)   # (B,L,H*dv), (B,L,H)

    if mix:
        # PyTorch: out.transpose(2, 1).contiguous().view(B, L, -1)
        out = out.reshape(B, L, H, d_values).transpose(0, 2, 1, 3)
        out = out.reshape(B, L, H * d_values)

    y = pallas_linear(out.reshape(B * L, -1), wo, bo, out_dtype=out_dtype)
    y = y.reshape(B, L, -1)

    attn = None
    if output_attention:
        attn = pallas_attention_probs(q, k, lse, H, attn_dtype=attn_dtype)
    return y, attn


# ----------------------------------------------------------------------------
# Deterministic parameter init (shapes from the module's __init__)
# ----------------------------------------------------------------------------
def init_params(key, d_model, n_heads, d_keys=None, d_values=None):
    d_keys = d_keys or d_model // n_heads
    d_values = d_values or d_model // n_heads
    ks = jax.random.split(key, 8)
    s_in = 1.0 / sqrt(d_model)
    s_out = 1.0 / sqrt(d_values * n_heads)
    return {
        "wq": jax.random.uniform(ks[0], (d_model, d_keys * n_heads), jnp.float32, -s_in, s_in),
        "bq": jax.random.uniform(ks[1], (d_keys * n_heads,), jnp.float32, -s_in, s_in),
        "wk": jax.random.uniform(ks[2], (d_model, d_keys * n_heads), jnp.float32, -s_in, s_in),
        "bk": jax.random.uniform(ks[3], (d_keys * n_heads,), jnp.float32, -s_in, s_in),
        "wv": jax.random.uniform(ks[4], (d_model, d_values * n_heads), jnp.float32, -s_in, s_in),
        "bv": jax.random.uniform(ks[5], (d_values * n_heads,), jnp.float32, -s_in, s_in),
        "wo": jax.random.uniform(ks[6], (d_values * n_heads, d_model), jnp.float32, -s_out, s_out),
        "bo": jax.random.uniform(ks[7], (d_model,), jnp.float32, -s_out, s_out),
    }


def _reference_forward(params, queries, keys, values, n_heads, mix=False):
    """Plain-JAX reference matching the PyTorch module (mask_flag=False)."""
    B, L, _ = queries.shape
    _, S, _ = keys.shape
    H = n_heads
    q = (queries @ params["wq"] + params["bq"]).reshape(B, L, H, -1)
    k = (keys @ params["wk"] + params["bk"]).reshape(B, S, H, -1)
    v = (values @ params["wv"] + params["bv"]).reshape(B, S, H, -1)
    scale = 1.0 / sqrt(q.shape[-1])
    scores = jnp.einsum("blhe,bshe->bhls", q, k) * scale
    A = jax.nn.softmax(scores, axis=-1)
    out = jnp.einsum("bhls,bshd->blhd", A, v)
    if mix:
        out = out.transpose(0, 2, 1, 3)
    out = out.reshape(B, L, -1)
    return out @ params["wo"] + params["bo"], A


if __name__ == "__main__":
    B, L, S, d_model, n_heads = 2, 8, 8, 32, 4

    key = jax.random.PRNGKey(0)
    kp, kx, kq, kk, kv = jax.random.split(key, 5)
    params = init_params(kp, d_model, n_heads)

    # 1) Self-attention (fused QKV projection, bf16 compute, attn probs out).
    x = jax.random.normal(kx, (B, L, d_model), jnp.float32)
    out, attn = attention_layer_forward(
        params, x, x, x, attn_mask=None, n_heads=n_heads,
        mix=False, output_attention=True)
    jax.block_until_ready((out, attn))
    assert out.shape == (B, L, d_model)
    assert attn.shape == (B, n_heads, L, S)

    ref_out, ref_attn = _reference_forward(params, x, x, x, n_heads)
    assert float(jnp.max(jnp.abs(out - ref_out))) < 5e-2
    assert float(jnp.max(jnp.abs(attn.astype(jnp.float32) - ref_attn))) < 2.5e-2

    # 2) Cross-attention with separate K/V (un-fused projections, bf16).
    queries = jax.random.normal(kq, (B, L, d_model), jnp.float32)
    keys = jax.random.normal(kk, (B, S, d_model), jnp.float32)
    values = jax.random.normal(kv, (B, S, d_model), jnp.float32)
    out2, attn2 = attention_layer_forward(
        params, queries, keys, values, attn_mask=None, n_heads=n_heads,
        mix=False, output_attention=False)
    jax.block_until_ready(out2)
    assert out2.shape == (B, L, d_model)
    assert attn2 is None
    ref_out2, _ = _reference_forward(params, queries, keys, values, n_heads)
    assert float(jnp.max(jnp.abs(out2 - ref_out2))) < 5e-2

    # 3) Cross-attention with shared K/V (fused KV projection), f32 compute.
    out3, _ = attention_layer_forward(
        params, queries, keys, keys, attn_mask=None, n_heads=n_heads,
        mix=False, output_attention=False, compute_dtype=None)
    jax.block_until_ready(out3)
    ref_out3, _ = _reference_forward(params, queries, keys, keys, n_heads)
    assert float(jnp.max(jnp.abs(out3 - ref_out3))) < 1e-2

    print("KERNEL_OK")
</pallas_src>

<mosaic_0001>
module attributes {stable_mosaic.version = 11 : i64} {
  func.func @kernel(%arg0: i32, %arg1: i32, %arg2: memref<16x32xbf16, #tpu.memory_space<vmem>>, %arg3: memref<32x32xbf16, #tpu.memory_space<vmem>>, %arg4: memref<32x32xbf16, #tpu.memory_space<vmem>>, %arg5: memref<32x32xbf16, #tpu.memory_space<vmem>>, %arg6: memref<1x32xf32, #tpu.memory_space<vmem>>, %arg7: memref<1x32xf32, #tpu.memory_space<vmem>>, %arg8: memref<1x32xf32, #tpu.memory_space<vmem>>, %arg9: memref<16x32xbf16, #tpu.memory_space<vmem>>, %arg10: memref<16x32xbf16, #tpu.memory_space<vmem>>, %arg11: memref<16x32xbf16, #tpu.memory_space<vmem>>, %arg12: memref<16x32xf32, #tpu.memory_space<vmem>>, %arg13: memref<16x32xf32, #tpu.memory_space<vmem>>, %arg14: memref<16x32xf32, #tpu.memory_space<vmem>>) attributes {dimension_semantics = [#tpu.dimension_semantics<parallel>, #tpu.dimension_semantics<arbitrary>], iteration_bounds = array<i64: 1, 1>, scalar_prefetch = 0 : i64, scratch_operands = 3 : i64, tpu.core_type = #tpu.core_type<tc>, window_params = [{transform_indices = @transform_0, window_bounds = array<i64: 16, 32>}, {transform_indices = @transform_1, window_bounds = array<i64: 32, 32>}, {transform_indices = @transform_2, window_bounds = array<i64: 32, 32>}, {transform_indices = @transform_3, window_bounds = array<i64: 32, 32>}, {pipeline_mode = #tpu.pipeline_mode<synchronous>, transform_indices = @transform_4, window_bounds = array<i64: 1, 32>}, {pipeline_mode = #tpu.pipeline_mode<synchronous>, transform_indices = @transform_5, window_bounds = array<i64: 1, 32>}, {pipeline_mode = #tpu.pipeline_mode<synchronous>, transform_indices = @transform_6, window_bounds = array<i64: 1, 32>}, {transform_indices = @transform_7, window_bounds = array<i64: 16, 32>}, {transform_indices = @transform_8, window_bounds = array<i64: 16, 32>}, {transform_indices = @transform_9, window_bounds = array<i64: 16, 32>}]} {
    %c0_i32 = arith.constant 0 : i32
    %0 = arith.cmpi eq, %arg1, %c0_i32 : i32
    %1 = arith.extui %0 : i1 to i32
    %c0_i32_0 = arith.constant 0 : i32
    %2 = arith.cmpi ne, %1, %c0_i32_0 : i32
    scf.if %2 {
      %cst_24 = arith.constant 0.000000e+00 : f32
      %22 = vector.broadcast %cst_24 : f32 to vector<16x32xf32>
      %c0_25 = arith.constant 0 : index
      %c0_26 = arith.constant 0 : index
      %23 = vector.load %arg12[%c0_25, %c0_26] : memref<16x32xf32, #tpu.memory_space<vmem>>, vector<16x32xf32>
      tpu.vector_store %arg12[%c0_25, %c0_26], %22 {strides = array<i32>} : memref<16x32xf32, #tpu.memory_space<vmem>>, vector<16x32xf32>,
      %cst_27 = arith.constant 0.000000e+00 : f32
      %24 = vector.broadcast %cst_27 : f32 to vector<16x32xf32>
      %c0_28 = arith.constant 0 : index
      %c0_29 = arith.constant 0 : index
      %25 = vector.load %arg13[%c0_28, %c0_29] : memref<16x32xf32, #tpu.memory_space<vmem>>, vector<16x32xf32>
      tpu.vector_store %arg13[%c0_28, %c0_29], %24 {strides = array<i32>} : memref<16x32xf32, #tpu.memory_space<vmem>>, vector<16x32xf32>,
      %cst_30 = arith.constant 0.000000e+00 : f32
      %26 = vector.broadcast %cst_30 : f32 to vector<16x32xf32>
      %c0_31 = arith.constant 0 : index
      %c0_32 = arith.constant 0 : index
      %27 = vector.load %arg14[%c0_31, %c0_32] : memref<16x32xf32, #tpu.memory_space<vmem>>, vector<16x32xf32>
      tpu.vector_store %arg14[%c0_31, %c0_32], %26 {strides = array<i32>} : memref<16x32xf32, #tpu.memory_space<vmem>>, vector<16x32xf32>,
    } else {
    }
    %c0 = arith.constant 0 : index
    %c0_1 = arith.constant 0 : index
    %3 = vector.load %arg2[%c0, %c0_1] : memref<16x32xbf16, #tpu.memory_space<vmem>>, vector<16x32xbf16>
    %c0_2 = arith.constant 0 : index
    %c0_3 = arith.constant 0 : index
    %4 = vector.load %arg12[%c0_2, %c0_3] : memref<16x32xf32, #tpu.memory_space<vmem>>, vector<16x32xf32>
    %c0_4 = arith.constant 0 : index
    %c0_5 = arith.constant 0 : index
    %5 = vector.load %arg3[%c0_4, %c0_5] : memref<32x32xbf16, #tpu.memory_space<vmem>>, vector<32x32xbf16>
    %cst = arith.constant dense<0.000000e+00> : vector<16x32xf32>
    %6 = tpu.matmul %3, %5, %cst {dimension_numbers = #tpu.dot_dimension_numbers<[1], [0], [0], [1], [0, 0, 1, 1], [], []>} : vector<16x32xbf16>, vector<32x32xbf16>, vector<16x32xf32> -> vector<16x32xf32>
    %7 = arith.addf %4, %6 : vector<16x32xf32>
    %c0_6 = arith.constant 0 : index
    %c0_7 = arith.constant 0 : index
    %8 = vector.load %arg12[%c0_6, %c0_7] : memref<16x32xf32, #tpu.memory_space<vmem>>, vector<16x32xf32>
    tpu.vector_store %arg12[%c0_6, %c0_7], %7 {strides = array<i32>} : memref<16x32xf32, #tpu.memory_space<vmem>>, vector<16x32xf32>,
    %c0_8 = arith.constant 0 : index
    %c0_9 = arith.constant 0 : index
    %9 = vector.load %arg13[%c0_8, %c0_9] : memref<16x32xf32, #tpu.memory_space<vmem>>, vector<16x32xf32>
    %c0_10 = arith.constant 0 : index
    %c0_11 = arith.constant 0 : index
    %10 = vector.load %arg4[%c0_10, %c0_11] : memref<32x32xbf16, #tpu.memory_space<vmem>>, vector<32x32xbf16>
    %cst_12 = arith.constant dense<0.000000e+00> : vector<16x32xf32>
    %11 = tpu.matmul %3, %10, %cst_12 {dimension_numbers = #tpu.dot_dimension_numbers<[1], [0], [0], [1], [0, 0, 1, 1], [], []>} : vector<16x32xbf16>, vector<32x32xbf16>, vector<16x32xf32> -> vector<16x32xf32>
    %12 = arith.addf %9, %11 : vector<16x32xf32>
    %c0_13 = arith.constant 0 : index
    %c0_14 = arith.constant 0 : index
    %13 = vector.load %arg13[%c0_13, %c0_14] : memref<16x32xf32, #tpu.memory_space<vmem>>, vector<16x32xf32>
    tpu.vector_store %arg13[%c0_13, %c0_14], %12 {strides = array<i32>} : memref<16x32xf32, #tpu.memory_space<vmem>>, vector<16x32xf32>,
    %c0_15 = arith.constant 0 : index
    %c0_16 = arith.constant 0 : index
    %14 = vector.load %arg14[%c0_15, %c0_16] : memref<16x32xf32, #tpu.memory_space<vmem>>, vector<16x32xf32>
    %c0_17 = arith.constant 0 : index
    %c0_18 = arith.constant 0 : index
    %15 = vector.load %arg5[%c0_17, %c0_18] : memref<32x32xbf16, #tpu.memory_space<vmem>>, vector<32x32xbf16>
    %cst_19 = arith.constant dense<0.000000e+00> : vector<16x32xf32>
    %16 = tpu.matmul %3, %15, %cst_19 {dimension_numbers = #tpu.dot_dimension_numbers<[1], [0], [0], [1], [0, 0, 1, 1], [], []>} : vector<16x32xbf16>, vector<32x32xbf16>, vector<16x32xf32> -> vector<16x32xf32>
    %17 = arith.addf %14, %16 : vector<16x32xf32>
    %c0_20 = arith.constant 0 : index
    %c0_21 = arith.constant 0 : index
    %18 = vector.load %arg14[%c0_20, %c0_21] : memref<16x32xf32, #tpu.memory_space<vmem>>, vector<16x32xf32>
    tpu.vector_store %arg14[%c0_20, %c0_21], %17 {strides = array<i32>} : memref<16x32xf32, #tpu.memory_space<vmem>>, vector<16x32xf32>,
    %c0_i32_22 = arith.constant 0 : i32
    %19 = arith.cmpi eq, %arg1, %c0_i32_22 : i32
    %20 = arith.extui %19 : i1 to i32
    %c0_i32_23 = arith.constant 0 : i32
    %21 = arith.cmpi ne, %20, %c0_i32_23 : i32
    scf.if %21 {
      %c0_24 = arith.constant 0 : index
      %c0_25 = arith.constant 0 : index
      %22 = vector.load %arg12[%c0_24, %c0_25] : memref<16x32xf32, #tpu.memory_space<vmem>>, vector<16x32xf32>
      %c0_26 = arith.constant 0 : index
      %c0_27 = arith.constant 0 : index
      %23 = vector.load %arg6[%c0_26, %c0_27] : memref<1x32xf32, #tpu.memory_space<vmem>>, vector<1x32xf32>
      %24 = vector.broadcast %23 : vector<1x32xf32> to vector<16x32xf32>
      %25 = arith.addf %22, %24 : vector<16x32xf32>
      %26 = arith.truncf %25 : vector<16x32xf32> to vector<16x32xbf16>
      %c0_28 = arith.constant 0 : index
      %c0_29 = arith.constant 0 : index
      %27 = vector.load %arg9[%c0_28, %c0_29] : memref<16x32xbf16, #tpu.memory_space<vmem>>, vector<16x32xbf16>
      tpu.vector_store %arg9[%c0_28, %c0_29], %26 {strides = array<i32>} : memref<16x32xbf16, #tpu.memory_space<vmem>>, vector<16x32xbf16>,
      %c0_30 = arith.constant 0 : index
      %c0_31 = arith.constant 0 : index
      %28 = vector.load %arg13[%c0_30, %c0_31] : memref<16x32xf32, #tpu.memory_space<vmem>>, vector<16x32xf32>
      %c0_32 = arith.constant 0 : index
      %c0_33 = arith.constant 0 : index
      %29 = vector.load %arg7[%c0_32, %c0_33] : memref<1x32xf32, #tpu.memory_space<vmem>>, vector<1x32xf32>
      %30 = vector.broadcast %29 : vector<1x32xf32> to vector<16x32xf32>
      %31 = arith.addf %28, %30 : vector<16x32xf32>
      %32 = arith.truncf %31 : vector<16x32xf32> to vector<16x32xbf16>
      %c0_34 = arith.constant 0 : index
      %c0_35 = arith.constant 0 : index
      %33 = vector.load %arg10[%c0_34, %c0_35] : memref<16x32xbf16, #tpu.memory_space<vmem>>, vector<16x32xbf16>
      tpu.vector_store %arg10[%c0_34, %c0_35], %32 {strides = array<i32>} : memref<16x32xbf16, #tpu.memory_space<vmem>>, vector<16x32xbf16>,
      %c0_36 = arith.constant 0 : index
      %c0_37 = arith.constant 0 : index
      %34 = vector.load %arg14[%c0_36, %c0_37] : memref<16x32xf32, #tpu.memory_space<vmem>>, vector<16x32xf32>
      %c0_38 = arith.constant 0 : index
      %c0_39 = arith.constant 0 : index
      %35 = vector.load %arg8[%c0_38, %c0_39] : memref<1x32xf32, #tpu.memory_space<vmem>>, vector<1x32xf32>
      %36 = vector.broadcast %35 : vector<1x32xf32> to vector<16x32xf32>
      %37 = arith.addf %34, %36 : vector<16x32xf32>
      %38 = arith.truncf %37 : vector<16x32xf32> to vector<16x32xbf16>
      %c0_40 = arith.constant 0 : index
      %c0_41 = arith.constant 0 : index
      %39 = vector.load %arg11[%c0_40, %c0_41] : memref<16x32xbf16, #tpu.memory_space<vmem>>, vector<16x32xbf16>
      tpu.vector_store %arg11[%c0_40, %c0_41], %38 {strides = array<i32>} : memref<16x32xbf16, #tpu.memory_space<vmem>>, vector<16x32xbf16>,
    } else {
    }
    return
  }
  func.func @transform_0(%arg0: i32, %arg1: i32) -> (i32, i32) {
    %c0_i32 = arith.constant 0 : i32
    return %arg0, %arg1 : i32, i32
  }
  func.func @transform_1(%arg0: i32, %arg1: i32) -> (i32, i32) {
    %c0_i32 = arith.constant 0 : i32
    %c0_i32_0 = arith.constant 0 : i32
    return %arg1, %c0_i32 : i32, i32
  }
  func.func @transform_2(%arg0: i32, %arg1: i32) -> (i32, i32) {
    %c0_i32 = arith.constant 0 : i32
    %c0_i32_0 = arith.constant 0 : i32
    return %arg1, %c0_i32 : i32, i32
  }
  func.func @transform_3(%arg0: i32, %arg1: i32) -> (i32, i32) {
    %c0_i32 = arith.constant 0 : i32
    %c0_i32_0 = arith.constant 0 : i32
    return %arg1, %c0_i32 : i32, i32
  }
  func.func @transform_4(%arg0: i32, %arg1: i32) -> (i32, i32) {
    %c0_i32 = arith.constant 0 : i32
    %c0_i32_0 = arith.constant 0 : i32
    %c0_i32_1 = arith.constant 0 : i32
    return %c0_i32, %c0_i32_0 : i32, i32
  }
  func.func @transform_5(%arg0: i32, %arg1: i32) -> (i32, i32) {
    %c0_i32 = arith.constant 0 : i32
    %c0_i32_0 = arith.constant 0 : i32
    %c0_i32_1 = arith.constant 0 : i32
    return %c0_i32, %c0_i32_0 : i32, i32
  }
  func.func @transform_6(%arg0: i32, %arg1: i32) -> (i32, i32) {
    %c0_i32 = arith.constant 0 : i32
    %c0_i32_0 = arith.constant 0 : i32
    %c0_i32_1 = arith.constant 0 : i32
    return %c0_i32, %c0_i32_0 : i32, i32
  }
  func.func @transform_7(%arg0: i32, %arg1: i32) -> (i32, i32) {
    %c0_i32 = arith.constant 0 : i32
    %c0_i32_0 = arith.constant 0 : i32
    return %arg0, %c0_i32 : i32, i32
  }
  func.func @transform_8(%arg0: i32, %arg1: i32) -> (i32, i32) {
    %c0_i32 = arith.constant 0 : i32
    %c0_i32_0 = arith.constant 0 : i32
    return %arg0, %c0_i32 : i32, i32
  }
  func.func @transform_9(%arg0: i32, %arg1: i32) -> (i32, i32) {
    %c0_i32 = arith.constant 0 : i32
    %c0_i32_0 = arith.constant 0 : i32
    return %arg0, %c0_i32 : i32, i32
  }
}

</mosaic_0001>

<bundles_post_ra>
// kernel: tpu_custom_call.1
= control target key start
LH: loop header
LB: loop body
LE: loop exit
PB: predicated region body
PF: predicated region fallthrough
CT: control target
= control target key end

     0   :  { %15 = vsyncpa [#allocation6], 0  ;;  %s682_s0 = inlined_call_operand.hbm [shape: bf16[16,32], index: 0, kind: input, shape index: {}]   ;;  %s683_s1 = inlined_call_operand.hbm [shape: bf16[32,32], index: 1, kind: input, shape index: {}]   ;;  %s684_s2 = inlined_call_operand.hbm [shape: bf16[32,32], index: 2, kind: input, shape index: {}]   ;;  %s685_s3 = inlined_call_operand.hbm [shape: bf16[32,32], index: 3, kind: input, shape index: {}]   ;;  %s686_s4 = inlined_call_operand.vmem [shape: f32[1,32], index: 4, kind: input, shape index: {}]   ;;  %s687_s5 = inlined_call_operand.vmem [shape: f32[1,32], index: 5, kind: input, shape index: {}]   ;;  %s688_s6 = inlined_call_operand.vmem [shape: f32[1,32], index: 6, kind: input, shape index: {}]   ;;  %s689_s7 = inlined_call_operand.hbm [shape: bf16[16,32], index: 7, kind: output, shape index: {0}]   ;;  %s690_s8 = inlined_call_operand.hbm [shape: bf16[16,32], index: 8, kind: output, shape index: {1}]   ;;  %s691_s9 = inlined_call_operand.hbm [shape: bf16[16,32], index: 9, kind: output, shape index: {2}]  }
   0x1   :  { %16 = vsyncpa [#allocation9], 0 }
   0x2   :  { %17 = vsyncpa [#allocation12], 0 }
   0x3   :  { %18 = vsyncpa [#allocation7], 0 }
   0x4   :  { %19 = vsyncpa [#allocation15], 0  ;;  %s37_s11 = sshll.u32 %s683_s1, 4  ;;  %s550_s12 = smov [#allocation8]   ;;  %s38_s11 = int_to_ptr.hbm [resolvable:$true] %s37_s11 }
   0x5   :  { %s39_s13 = sshll.u32 %s550_s12, 4  ;;  %s24_s16 = sshll.u32 %s682_s0, 4  ;;  %s40_s13 = int_to_ptr.vmem [resolvable:$true] %s39_s13  ;;  %s25_s16 = int_to_ptr.hbm [resolvable:$true] %s24_s16 }
   0x6   :  { %s551_s17 = smov 64   ;;  %s552_s18 = smov 4  }
   0x7   :  { %45 = dma.hbm_to_vmem [thread:$0]  %s38_s11, 256, %s40_s13, [#allocation9], %s551_s17, %s551_s17, %s552_s18  }
   0x8   :  { %s553_s19 = smov [#allocation5]   ;;  %s50_s1 = sshll.u32 %s684_s2, 4  ;;  %s51_s1 = int_to_ptr.hbm [resolvable:$true] %s50_s1 }
   0x9   :  { %s26_s20 = sshll.u32 %s553_s19, 4  ;;  %s63_s24 = sshll.u32 %s685_s3, 4  ;;  %s27_s20 = int_to_ptr.vmem [resolvable:$true] %s26_s20  ;;  %s64_s24 = int_to_ptr.hbm [resolvable:$true] %s63_s24 }
   0xa   :  { %32 = dma.hbm_to_vmem [thread:$0]  %s25_s16, 128, %s27_s20, [#allocation6], %s551_s17, %s551_s17, %s552_s18  }
   0xb   :  { %s554_s25 = smov [#allocation10]   ;;  %s555_s27 = smov [#allocation11]  }
   0xc   :  { %s52_s26 = sshll.u32 %s554_s25, 4  ;;  %s65_s2 = sshll.u32 %s555_s27, 4  ;;  %s53_s26 = int_to_ptr.vmem [resolvable:$true] %s52_s26  ;;  %s66_s2 = int_to_ptr.vmem [resolvable:$true] %s65_s2 }
   0xd   :  { %58 = dma.hbm_to_vmem [thread:$0]  %s51_s1, 256, %s53_s26, [#allocation9], %s551_s17, %s551_s17, %s552_s18  }
   0xe   :  { %71 = dma.hbm_to_vmem [thread:$0]  %s64_s24, 256, %s66_s2, [#allocation12], %s551_s17, %s551_s17, %s552_s18  }
   0xf   :  { %540 = dma.done.wait [#allocation6], 128  }
  0x10   :  { %541 = vsyncadd [#allocation6], 4294967168 }
  0x11   :  { %542 = dma.done.wait [#allocation9], 512  }
  0x12   :  { %543 = vsyncadd [#allocation9], 4294966784 }
  0x13   :  { %544 = dma.done.wait [#allocation12], 256  }
  0x14   :  { %545 = vsyncadd [#allocation12], 4294967040  ;;  %vm99_vm0 = vcmask 261120   ;;  %v556_v0 = vmov 0.0   ;;  %v354_v1 = vld [vmem:[#allocation8 + $0x8] sm:$0xff]  ;;  %v356_v2 = vld [vmem:[#allocation10 + $0x8] sm:$0xff] }
  0x15   :  { %100 = vst.msk [vmem:[#allocation2] sm:$0xff] %vm99_vm0, %v556_v0  ;;  %v358_v3 = vld [vmem:[#allocation11 + $0x8] sm:$0xff]  ;;  %141 = vmatpush.bf16.msra.mxu0 %v354_v1  ;;  %177 = vmatpush.bf16.msra.mxu1 %v356_v2  ;;  %v353_v4 = vld [vmem:[#allocation8] sm:$0xff]  ;;  %v355_v5 = vld [vmem:[#allocation10] sm:$0xff]  ;;  %vm238_vm1 = vcmask 257024   ;;  %s271_s14 = sshll.u32 %s689_s7, 4  ;;  %s272_s14 = int_to_ptr.hbm [resolvable:$true] %s271_s14 }
  0x16   :  { %101 = vst.msk [vmem:[#allocation2 + $0x8] sm:$0xff] %vm99_vm0, %v556_v0  ;;  %213 = vmatpush.bf16.msra.mxu2 %v358_v3  ;;  %v357_v6 = vld [vmem:[#allocation11] sm:$0xff]  ;;  %v352_v7 = vld [vmem:[#allocation5] sm:$0xff]  ;;  %v370_v18 = vld [vmem:[%s686_s4] ss:$0 sm:$0xff]  ;;  %s558_s15 = smov [#allocation14]  }
  0x17   :  { %102 = vst.msk [vmem:[#allocation3] sm:$0xff] %vm99_vm0, %v556_v0  ;;  %v369_v22 = vld [vmem:[%s687_s5] ss:$0 sm:$0xff]  ;;  %s557_s5 = smov [#allocation13]   ;;  %s284_s20 = sshll.u32 %s690_s8, 4  ;;  %s285_s20 = int_to_ptr.hbm [resolvable:$true] %s284_s20 }
  0x18   :  { %103 = vst.msk [vmem:[#allocation3 + $0x8] sm:$0xff] %vm99_vm0, %v556_v0  ;;  %v371_v32 = vld [vmem:[%s688_s6] ss:$0 sm:$0xff]  ;;  %s269_s11 = sshll.u32 %s557_s5, 4  ;;  %s282_s6 = sshll.u32 %s558_s15, 4  ;;  %s270_s11 = int_to_ptr.vmem [resolvable:$true] %s269_s11  ;;  %s283_s6 = int_to_ptr.vmem [resolvable:$true] %s282_s6 }
  0x19   :  { %104 = vst.msk [vmem:[#allocation4] sm:$0xff] %vm99_vm0, %v556_v0  ;;  %142 = vmatpush.bf16.msra.mxu0 %v353_v4  ;;  %178 = vmatpush.bf16.msra.mxu1 %v355_v5  ;;  %s559_s7 = smov [#allocation16]   ;;  %s297_s0 = sshll.u32 %s691_s9, 4  ;;  %s298_s0 = int_to_ptr.hbm [resolvable:$true] %s297_s0 }
  0x1a   :  { %105 = vst.msk [vmem:[#allocation4 + $0x8] sm:$0xff] %vm99_vm0, %v556_v0  ;;  %214 = vmatpush.bf16.msra.mxu2 %v357_v6  ;;  %s295_s21 = sshll.u32 %s559_s7, 4  ;;  %s296_s21 = int_to_ptr.vmem [resolvable:$true] %s295_s21 }
  0x1c   :  { %333 = vmatmul.msk.bf16.vlgmr.msra.gmra.mxu0 %vm99_vm0, %v352_v7  ;;  %342 = vmatmul.msk.bf16.vlgmr.msra.gmra.mxu1 %vm99_vm0, %v352_v7  ;;  %v108_v8 = vld [vmem:[#allocation2] sm:$0xff] }
  0x1d   :  { %351 = vmatmul.msk.bf16.vlgmr.msra.gmra.mxu2 %vm99_vm0, %v352_v7  ;;  %v109_v15 = vld [vmem:[#allocation2 + $0x8] sm:$0xff] }
  0x1e   :  { %v153_v9 = vld [vmem:[#allocation3] sm:$0xff] }
  0x1f   :  { %v154_v16 = vld [vmem:[#allocation3 + $0x8] sm:$0xff] }
  0x20   :  { %v189_v14 = vld [vmem:[#allocation4] sm:$0xff] }
  0x21   :  { %v190_v29 = vld [vmem:[#allocation4 + $0x8] sm:$0xff] }
  0x99   :  { %v144_v10 = vpop.f32.mrf.mxu0  ;;  %v180_v11 = vpop.f32.mrf.mxu1 }
  0x9a   :  { %v149_v12 = vadd.f32 %v144_v10, %v108_v8  ;;  %v185_v13 = vadd.f32 %v180_v11, %v153_v9 }
  0x9c   :  { %151 = vst.msk [vmem:[#allocation2] sm:$0xff] %vm99_vm0, %v149_v12 }
  0x9d   :  { %187 = vst.msk [vmem:[#allocation3] sm:$0xff] %vm99_vm0, %v185_v13 }
  0xa0   :  { %v216_v17 = vpop.f32.mrf.mxu2 }
  0xa1   :  { %v221_v19 = vadd.f32 %v216_v17, %v189_v14  ;;  %v146_v20 = vpop.f32.mrf.mxu0  ;;  %v182_v21 = vpop.f32.mrf.mxu1 }
  0xa2   :  { %v150_v23 = vadd.f32 %v146_v20, %v109_v15  ;;  %v186_v24 = vadd.f32 %v182_v21, %v154_v16 }
  0xa3   :  { %223 = vst.msk [vmem:[#allocation4] sm:$0xff] %vm99_vm0, %v221_v19  ;;  %v228_v25 = vld [vmem:[#allocation2] sm:$0xff] }
  0xa4   :  { %152 = vst.msk [vmem:[#allocation2 + $0x8] sm:$0xff] %vm99_vm0, %v150_v23  ;;  %v241_v26 = vld [vmem:[#allocation3] sm:$0xff]  ;;  %v234_v27 = vadd.f32 %v370_v18, %v228_v25 }
  0xa5   :  { %188 = vst.msk [vmem:[#allocation3 + $0x8] sm:$0xff] %vm99_vm0, %v186_v24  ;;  %v247_v28 = vadd.f32 %v369_v22, %v241_v26 }
  0xa6   :  { %v236_v30 = vpack.c.bf16 %v234_v27, %v234_v27 }
  0xa7   :  { %v249_v31 = vpack.c.bf16 %v247_v28, %v247_v28 }
  0xa8   :  { %v218_v33 = vpop.f32.mrf.mxu2  ;;  %239 = vst.msk [vmem:[#allocation13] sm:$0xf] %vm238_vm1, %v236_v30 }
  0xa9   :  { %v222_v34 = vadd.f32 %v218_v33, %v190_v29  ;;  %251 = vst.msk [vmem:[#allocation14] sm:$0xf] %vm238_vm1, %v249_v31 }
  0xaa   :  { %v253_v35 = vld [vmem:[#allocation4] sm:$0xff] }
  0xab   :  { %224 = vst.msk [vmem:[#allocation4 + $0x8] sm:$0xff] %vm99_vm0, %v222_v34  ;;  %v229_v36 = vld [vmem:[#allocation2 + $0x8] sm:$0xff]  ;;  %v259_v37 = vadd.f32 %v371_v32, %v253_v35 }
  0xac   :  { %v242_v38 = vld [vmem:[#allocation3 + $0x8] sm:$0xff]  ;;  %v235_v39 = vadd.f32 %v370_v18, %v229_v36 }
  0xad   :  { %v248_v40 = vadd.f32 %v369_v22, %v242_v38  ;;  %v261_v41 = vpack.c.bf16 %v259_v37, %v259_v37 }
  0xae   :  { %v237_v42 = vpack.c.bf16 %v235_v39, %v235_v39 }
  0xaf   :  { %v250_v43 = vpack.c.bf16 %v248_v40, %v248_v40  ;;  %263 = vst.msk [vmem:[#allocation16] sm:$0xf] %vm238_vm1, %v261_v41 }
  0xb0   :  { %240 = vst.msk [vmem:[#allocation13 + $0x4] sm:$0xf] %vm238_vm1, %v237_v42 }
  0xb1   :  { %252 = vst.msk [vmem:[#allocation14 + $0x4] sm:$0xf] %vm238_vm1, %v250_v43  ;;  %277 = dma.vmem_to_hbm [thread:$0]  %s270_s11, 128, %s272_s14, [#allocation7], %s551_s17, %s551_s17, %s552_s18  }
  0xb2   :  { %290 = dma.vmem_to_hbm [thread:$0]  %s283_s6, 128, %s285_s20, [#allocation15], %s551_s17, %s551_s17, %s552_s18   ;;  %v254_v44 = vld [vmem:[#allocation4 + $0x8] sm:$0xff] }
  0xb3   :  { %v260_v45 = vadd.f32 %v371_v32, %v254_v44 }
  0xb5   :  { %v262_v46 = vpack.c.bf16 %v260_v45, %v260_v45 }
  0xb7   :  { %264 = vst.msk [vmem:[#allocation16 + $0x4] sm:$0xf] %vm238_vm1, %v262_v46 }
  0xb8   :  { %303 = dma.vmem_to_hbm [thread:$0]  %s296_s21, 128, %s298_s0, [#allocation15], %s551_s17, %s551_s17, %s552_s18  }
  0xb9   :  { %546 = dma.done.wait [#allocation7], 128  }
  0xba   :  { %547 = vsyncadd [#allocation7], 4294967168 }
  0xbb   :  { %548 = dma.done.wait [#allocation15], 256  }
  0xbc   :  { %549 = vsyncadd [#allocation15], 4294967040 }
  0xbd   :  { %316 = vsyncpa [#allocation6], 1 }
  0xbe   :  { %317 = vsyncpa [#allocation9], 1 }
  0xbf   :  { %318 = vsyncpa [#allocation12], 1 }
  0xc0   :  { %319 = vsyncpa [#allocation7], 1 }
  0xc1   :  { %320 = vsyncpa [#allocation15], 1 }

</bundles_post_ra>
